<compile_context>
chip_gen: v7x
topology: tpu7x:2x2x1
jax: 0.10.0
libtpu: 0.0.40
codegen_flags: <defaults>
</compile_context>

<pallas_src>
import functools

import numpy as np
import jax
import jax.numpy as jnp
from jax import lax
from jax.experimental import pallas as pl
from jax.experimental.pallas import tpu as pltpu

EPS = 1e-12  # torch.nn.functional.normalize default eps

_VMEM = pl.BlockSpec(memory_space=pltpu.MemorySpace.VMEM)


def _l2norm(x):
    # matches torch F.normalize(x, dim=-1): x / max(||x||_2, eps)
    # implemented as x * rsqrt(max(||x||^2, eps^2))  (EUP rsqrt, no divide)
    ss = jnp.sum(x * x, axis=-1, keepdims=True)
    return x * lax.rsqrt(jnp.maximum(ss, jnp.float32(EPS * EPS)))


# --------------------------------------------------------------------------
# Kernel 1: LightGCN propagation ("computer") — tiled A @ E on the MXU
# --------------------------------------------------------------------------
def _spmm_kernel(a_ref, e_ref, o_ref, acc_ref):
    # a_ref: (T, T) bf16 adjacency tile, e_ref: (T, D) bf16 activation tile
    @pl.when(pl.program_id(1) == 0)
    def _():
        acc_ref[...] = jnp.zeros_like(acc_ref)

    acc_ref[...] += jnp.dot(a_ref[...], e_ref[...],
                            preferred_element_type=jnp.float32)

    @pl.when(pl.program_id(1) == pl.num_programs(1) - 1)
    def _():
        o_ref[...] = acc_ref[...]


def _pick_tile(n_pad):
    # n_pad is a multiple of 128; pick the largest tile that divides it.
    for t in (512, 256, 128):
        if n_pad % t == 0:
            return t
    return 128


def _make_spmm(n_pad, d, tile):
    return pl.pallas_call(
        _spmm_kernel,
        out_shape=jax.ShapeDtypeStruct((n_pad, d), jnp.float32),
        grid_spec=pltpu.PrefetchScalarGridSpec(
            num_scalar_prefetch=0,
            grid=(n_pad // tile, n_pad // tile),
            in_specs=[pl.BlockSpec((tile, tile), lambda i, k: (i, k)),
                      pl.BlockSpec((tile, d), lambda i, k: (k, 0))],
            out_specs=pl.BlockSpec((tile, d), lambda i, k: (i, 0)),
            scratch_shapes=[pltpu.VMEM((tile, d), jnp.float32)]),
        compiler_params=pltpu.CompilerParams(
            dimension_semantics=("parallel", "arbitrary")),
    )


def gcn_propagate(adj_bf16, emb0, num_layers):
    """LightGCN: mean of [E, A@E, A@(A@E), ...]. A is bf16, accumulation f32."""
    n_pad, d = emb0.shape
    tile = _pick_tile(n_pad)
    spmm = _make_spmm(n_pad, d, tile)
    acc = emb0
    cur = emb0
    for _ in range(num_layers):
        cur = spmm(adj_bf16, cur.astype(jnp.bfloat16))
        acc = acc + cur
    return acc / jnp.float32(num_layers + 1)


# --------------------------------------------------------------------------
# Kernel 2 (fused): normalize + popularity-gated projection + all 4 losses
# --------------------------------------------------------------------------
def _proj_loss_kernel(ue_ref, ie_ref, su_ref, si_ref, pu_ref, pi_ref,
                      ar_ref, au_ref, unr_ref, unu_ref, *, t):
    ue = _l2norm(ue_ref[...].astype(jnp.float32))          # normalized users_emb
    ie = _l2norm(ie_ref[...].astype(jnp.float32))          # normalized items_emb
    b, d = ue.shape

    # one matmul per side against the stacked (D, 2D) projection,
    # then select the popularity group per row (pop in {0, 1}).
    ru_all = jnp.dot(ue, pu_ref[...], preferred_element_type=jnp.float32)  # (B, 2D)
    ri_all = jnp.dot(ie, pi_ref[...], preferred_element_type=jnp.float32)
    su = su_ref[...]                                       # (B,1) f32: 1.0 iff pop==0
    si = si_ref[...]
    ru = su * ru_all[:, :d] + (1.0 - su) * ru_all[:, d:]
    ri = si * ri_all[:, :d] + (1.0 - si) * ri_all[:, d:]
    ru = _l2norm(ru)   # torch normalizes users_relation (twice, idempotent); items_relation not

    # align_relation = mean_i ||ru_i - ri_i||_2^2   (o_space=True branch)
    ar_ref[...] = jnp.mean(jnp.sum((ru - ri) ** 2, axis=-1, keepdims=True),
                           axis=0, keepdims=True)

    # align_unbias = mean_i (1/w_i) * ||ue_i - ie_i||_2^2, w = clamp(sigmoid(<ru,ri>), 0.1)
    w = jnp.maximum(jax.nn.sigmoid(jnp.sum(ru * ri, axis=-1, keepdims=True)), 0.1)
    d_emb = jnp.sum((ue - ie) ** 2, axis=-1, keepdims=True)
    au_ref[...] = jnp.mean(d_emb / w, axis=0, keepdims=True)

    # uniformity losses
    rows = lax.broadcasted_iota(jnp.int32, (b, b), 0)
    cols = lax.broadcasted_iota(jnp.int32, (b, b), 1)
    upper = rows < cols          # strict upper triangle (torch.triu diagonal=1)
    eye = rows == cols
    cnt = jnp.float32(b * (b - 1) / 2.0)

    def lunif(x):
        # pairwise squared distances via Gram matrix on the MXU
        g = lax.dot_general(x, x, (((1,), (1,)), ((), ())),
                            preferred_element_type=jnp.float32)      # (B, B)
        d_col = jnp.sum(x * x, axis=-1, keepdims=True)               # (B, 1) direct VPU reduce
        d_row = jnp.sum(jnp.where(eye, g, 0.0), axis=0, keepdims=True)  # (1, B)
        sq = jnp.maximum(d_col + d_row - 2.0 * g, 0.0)               # cdist(x,x)^2
        vals = jnp.where(upper, jnp.exp(-t * sq), 0.0)
        return jnp.log(jnp.sum(vals, axis=(0, 1), keepdims=True) / cnt)

    unr_ref[...] = 0.5 * (lunif(ru) + lunif(ri))
    unu_ref[...] = 0.5 * (lunif(ue) + lunif(ie))


def fused_proj_losses(u_emb, i_emb, sel_u, sel_i, proj_u2, proj_i2, *, t=2.0):
    one = jax.ShapeDtypeStruct((1, 1), jnp.float32)
    return pl.pallas_call(
        functools.partial(_proj_loss_kernel, t=t),
        out_shape=(one, one, one, one),
        in_specs=[_VMEM] * 6,
        out_specs=(_VMEM,) * 4,
    )(u_emb, i_emb, sel_u, sel_i, proj_u2, proj_i2)


# --------------------------------------------------------------------------
# Glue (parameter / graph setup, gathers) — plain numpy / JAX
# --------------------------------------------------------------------------
def get_ui_pop(data_train, num_users, num_items):
    train_users = np.array([d[0] for d in data_train], dtype=np.int64)
    train_items = np.array([d[1] for d in data_train], dtype=np.int64)

    def group(ids, cnts, total, default):
        pop = np.full(total, default, dtype=np.int64)
        pop[ids] = cnts
        sorted_idx = np.argsort(cnts, kind="stable")
        thr = int(len(sorted_idx) * 0.8) - 1
        gv0 = int(cnts[sorted_idx[thr]])
        out = pop.copy()
        out = np.where((-1 < pop) & (pop <= gv0), 0, out)
        out = np.where((gv0 < pop) & (pop <= pop.max()), 1, out)
        return out

    item_ids, item_cnt = np.unique(train_items, return_counts=True)
    i_pop = group(item_ids, item_cnt, num_items, 1)
    user_ids, user_cnt = np.unique(train_users, return_counts=True)
    u_pop = group(user_ids, user_cnt, num_users, 0)
    return u_pop, i_pop


def build_norm_adj(data_train, num_users, num_items, n_pad):
    """Dense normalized adjacency (D^-1/2 A D^-1/2), zero-padded to (n_pad, n_pad)."""
    n = num_users + num_items
    r = np.zeros((num_users, num_items), dtype=np.float32)
    for u, i in data_train:
        r[u, i] = 1.0
    a = np.zeros((n, n), dtype=np.float32)
    a[:num_users, num_users:] = r
    a[num_users:, :num_users] = r.T
    rowsum = a.sum(axis=1)
    d_inv = np.zeros_like(rowsum)
    nz = rowsum > 0
    d_inv[nz] = rowsum[nz] ** -0.5
    norm = d_inv[:, None] * a * d_inv[None, :]
    out = np.zeros((n_pad, n_pad), dtype=np.float32)
    out[:n, :n] = norm
    return out


def uctrl_forward(adj_pad_bf16, user_w, item_w, proj_u, proj_i,
                  users_pop, items_pop, users, items, num_layers):
    num_users, d = user_w.shape
    num_items = item_w.shape[0]
    n = num_users + num_items
    n_pad = adj_pad_bf16.shape[0]

    emb0 = jnp.concatenate([user_w, item_w], axis=0)
    emb0 = jnp.pad(emb0, ((0, n_pad - n), (0, 0)))          # zero rows: no effect
    light = gcn_propagate(adj_pad_bf16, emb0, num_layers)   # Pallas kernel 1 (per layer)
    all_users = light[:num_users]
    all_items = light[num_users:n]

    u_emb = all_users[users]
    i_emb = all_items[items]
    # popularity-group selector as a (B,1) f32 mask (pop in {0,1})
    sel_u = (users_pop[users] == 0).astype(jnp.float32)[:, None]
    sel_i = (items_pop[items] == 0).astype(jnp.float32)[:, None]

    # stack the two popularity-group projections into one (D, 2D) RHS
    proj_u2 = jnp.concatenate([proj_u[0], proj_u[1]], axis=1)
    proj_i2 = jnp.concatenate([proj_i[0], proj_i[1]], axis=1)

    ar, au, unr, unu = fused_proj_losses(u_emb, i_emb, sel_u, sel_i,
                                         proj_u2, proj_i2)  # Pallas kernel 2 (fused)
    # (align_relation, align_unbias, uniform_relation, uniform_unbias)
    return ar[0, 0], au[0, 0], unr[0, 0], unu[0, 0]


if __name__ == "__main__":
    num_users, num_items, emb_size, layers, batch = 12, 20, 32, 2, 8

    key = jax.random.PRNGKey(0)
    k1, k2, k3, k4, k5, k6, k7, k8 = jax.random.split(key, 8)

    # synthetic deterministic interaction data
    tu = np.asarray(jax.random.randint(k1, (100,), 0, num_users))
    ti = np.asarray(jax.random.randint(k2, (100,), 0, num_items))
    data_train = list(zip(tu.tolist(), ti.tolist()))

    u_pop_np, i_pop_np = get_ui_pop(data_train, num_users, num_items)

    n = num_users + num_items
    n_pad = max(128, ((n + 127) // 128) * 128)              # pad for (8,128) tiling
    adj_np = build_norm_adj(data_train, num_users, num_items, n_pad)
    adj_bf16 = jnp.asarray(adj_np, dtype=jnp.bfloat16)      # bf16 A: halve HBM bytes

    # deterministic parameter init (shapes from the module's __init__)
    user_w = jax.random.normal(k3, (num_users, emb_size), jnp.float32) * 0.01
    item_w = jax.random.normal(k4, (num_items, emb_size), jnp.float32) * 0.01
    xavier_std = float(np.sqrt(2.0 / (emb_size * emb_size + 2 * emb_size)))
    proj_u = jax.random.normal(k5, (2, emb_size, emb_size), jnp.float32) * xavier_std
    proj_i = jax.random.normal(k6, (2, emb_size, emb_size), jnp.float32) * xavier_std

    users = jax.random.randint(k7, (batch,), 0, num_users)
    items = jax.random.randint(k8, (batch,), 0, num_items)

    out = uctrl_forward(adj_bf16, user_w, item_w, proj_u, proj_i,
                        jnp.asarray(u_pop_np), jnp.asarray(i_pop_np),
                        users, items, layers)
    out = jax.block_until_ready(out)
    print("KERNEL_OK")
</pallas_src>

<mosaic_0001>
module attributes {stable_mosaic.version = 11 : i64} {
  func.func @_spmm_kernel(%arg0: i32, %arg1: i32, %arg2: memref<128x128xbf16, #tpu.memory_space<vmem>>, %arg3: memref<128x32xbf16, #tpu.memory_space<vmem>>, %arg4: memref<128x32xf32, #tpu.memory_space<vmem>>, %arg5: memref<128x32xf32, #tpu.memory_space<vmem>>) attributes {dimension_semantics = [#tpu.dimension_semantics<parallel>, #tpu.dimension_semantics<arbitrary>], iteration_bounds = array<i64: 1, 1>, scalar_prefetch = 0 : i64, scratch_operands = 1 : i64, tpu.core_type = #tpu.core_type<tc>, window_params = [{transform_indices = @transform_0, window_bounds = array<i64: 128, 128>}, {transform_indices = @transform_1, window_bounds = array<i64: 128, 32>}, {transform_indices = @transform_2, window_bounds = array<i64: 128, 32>}]} {
    %c0_i32 = arith.constant 0 : i32
    %0 = arith.cmpi eq, %arg1, %c0_i32 : i32
    %1 = arith.extui %0 : i1 to i32
    %c0_i32_0 = arith.constant 0 : i32
    %2 = arith.cmpi ne, %1, %c0_i32_0 : i32
    scf.if %2 {
      %cst_10 = arith.constant 0.000000e+00 : f32
      %12 = vector.broadcast %cst_10 : f32 to vector<128x32xf32>
      %c0_11 = arith.constant 0 : index
      %c0_12 = arith.constant 0 : index
      %13 = vector.load %arg5[%c0_11, %c0_12] : memref<128x32xf32, #tpu.memory_space<vmem>>, vector<128x32xf32>
      tpu.vector_store %arg5[%c0_11, %c0_12], %12 {strides = array<i32>} : memref<128x32xf32, #tpu.memory_space<vmem>>, vector<128x32xf32>,
    } else {
    }
    %c0 = arith.constant 0 : index
    %c0_1 = arith.constant 0 : index
    %3 = vector.load %arg5[%c0, %c0_1] : memref<128x32xf32, #tpu.memory_space<vmem>>, vector<128x32xf32>
    %c0_2 = arith.constant 0 : index
    %c0_3 = arith.constant 0 : index
    %4 = vector.load %arg2[%c0_2, %c0_3] : memref<128x128xbf16, #tpu.memory_space<vmem>>, vector<128x128xbf16>
    %c0_4 = arith.constant 0 : index
    %c0_5 = arith.constant 0 : index
    %5 = vector.load %arg3[%c0_4, %c0_5] : memref<128x32xbf16, #tpu.memory_space<vmem>>, vector<128x32xbf16>
    %cst = arith.constant dense<0.000000e+00> : vector<128x32xf32>
    %6 = tpu.matmul %4, %5, %cst {dimension_numbers = #tpu.dot_dimension_numbers<[1], [0], [0], [1], [0, 0, 1, 1], [], []>} : vector<128x128xbf16>, vector<128x32xbf16>, vector<128x32xf32> -> vector<128x32xf32>
    %7 = arith.addf %3, %6 : vector<128x32xf32>
    %c0_6 = arith.constant 0 : index
    %c0_7 = arith.constant 0 : index
    %8 = vector.load %arg5[%c0_6, %c0_7] : memref<128x32xf32, #tpu.memory_space<vmem>>, vector<128x32xf32>
    tpu.vector_store %arg5[%c0_6, %c0_7], %7 {strides = array<i32>} : memref<128x32xf32, #tpu.memory_space<vmem>>, vector<128x32xf32>,
    %c0_i32_8 = arith.constant 0 : i32
    %9 = arith.cmpi eq, %arg1, %c0_i32_8 : i32
    %10 = arith.extui %9 : i1 to i32
    %c0_i32_9 = arith.constant 0 : i32
    %11 = arith.cmpi ne, %10, %c0_i32_9 : i32
    scf.if %11 {
      %c0_10 = arith.constant 0 : index
      %c0_11 = arith.constant 0 : index
      %12 = vector.load %arg5[%c0_10, %c0_11] : memref<128x32xf32, #tpu.memory_space<vmem>>, vector<128x32xf32>
      %c0_12 = arith.constant 0 : index
      %c0_13 = arith.constant 0 : index
      %13 = vector.load %arg4[%c0_12, %c0_13] : memref<128x32xf32, #tpu.memory_space<vmem>>, vector<128x32xf32>
      tpu.vector_store %arg4[%c0_12, %c0_13], %12 {strides = array<i32>} : memref<128x32xf32, #tpu.memory_space<vmem>>, vector<128x32xf32>,
    } else {
    }
    return
  }
  func.func @transform_0(%arg0: i32, %arg1: i32) -> (i32, i32) {
    %c0_i32 = arith.constant 0 : i32
    return %arg0, %arg1 : i32, i32
  }
  func.func @transform_1(%arg0: i32, %arg1: i32) -> (i32, i32) {
    %c0_i32 = arith.constant 0 : i32
    %c0_i32_0 = arith.constant 0 : i32
    return %arg1, %c0_i32 : i32, i32
  }
  func.func @transform_2(%arg0: i32, %arg1: i32) -> (i32, i32) {
    %c0_i32 = arith.constant 0 : i32
    %c0_i32_0 = arith.constant 0 : i32
    return %arg0, %c0_i32 : i32, i32
  }
}

</mosaic_0001>

<bundles_post_ra>
// kernel: tpu_custom_call.1
= control target key start
LH: loop header
LB: loop body
LE: loop exit
PB: predicated region body
PF: predicated region fallthrough
CT: control target
= control target key end

     0   :  { %vm16_vm0 = vcmask 261120   ;;  %v443_v1 = vmov 0.0   ;;  %s603_s1 = inlined_call_operand.vmem [shape: bf16[128,32], index: 1, kind: input, shape index: {}]   ;;  %s604_s0 = inlined_call_operand.vmem [shape: bf16[128,128], index: 0, kind: input, shape index: {}]   ;;  %s605_s2 = inlined_call_operand.vmem [shape: f32[128,32], index: 2, kind: output, shape index: {}]  }
   0x1   :  { %v427_v0 = vld [vmem:[%s603_s1] sm:$0xff]   ;;  %19 = vst.msk [vmem:[#allocation2 + $0x10] sm:$0xff] %vm16_vm0, %v443_v1  ;;  %17 = vst.msk [vmem:[#allocation2] sm:$0xff] %vm16_vm0, %v443_v1  ;;  %v428_v2 = vld [vmem:[%s603_s1 + $0x8] sm:$0xff]  }
   0x2   :  { %18 = vst.msk [vmem:[#allocation2 + $0x8] sm:$0xff] %vm16_vm0, %v443_v1  ;;  %20 = vst.msk [vmem:[#allocation2 + $0x18] sm:$0xff] %vm16_vm0, %v443_v1  ;;  %378 = vmatprep.subr.bf16.mxu0 %v427_v0  ;;  %410 = vmatprep.subr.bf16.mxu1 %v427_v0  ;;  %v429_v3 = vld [vmem:[%s603_s1 + $0x10] sm:$0xff]   ;;  %v430_v4 = vld [vmem:[%s603_s1 + $0x18] sm:$0xff]  }
   0x3   :  { %21 = vst.msk [vmem:[#allocation2 + $0x20] sm:$0xff] %vm16_vm0, %v443_v1  ;;  %22 = vst.msk [vmem:[#allocation2 + $0x28] sm:$0xff] %vm16_vm0, %v443_v1  ;;  %379 = vmatpush3.bf16.msra.mxu0 %v427_v0  ;;  %418 = vmatpush3.bf16.msra.mxu1 %v427_v0  ;;  %v435_v5 = vld [vmem:[%s604_s0] sm:$0xff]   ;;  %v432_v8 = vld [vmem:[%s603_s1 + $0x28] sm:$0xff]  }
   0x4   :  { %23 = vst.msk [vmem:[#allocation2 + $0x30] sm:$0xff] %vm16_vm0, %v443_v1  ;;  %24 = vst.msk [vmem:[#allocation2 + $0x38] sm:$0xff] %vm16_vm0, %v443_v1  ;;  %380 = vmatprep.subr.bf16.mxu0 %v428_v2  ;;  %411 = vmatprep.subr.bf16.mxu1 %v428_v2  ;;  %v436_v6 = vld [vmem:[%s604_s0 + $0x20] sm:$0xff]   ;;  %v433_v9 = vld [vmem:[%s603_s1 + $0x30] sm:$0xff]  }
   0x5   :  { %25 = vst.msk [vmem:[#allocation2 + $0x40] sm:$0xff] %vm16_vm0, %v443_v1  ;;  %26 = vst.msk [vmem:[#allocation2 + $0x48] sm:$0xff] %vm16_vm0, %v443_v1  ;;  %394 = vmatprep.mubr.bf16.mxu0 %v435_v5  ;;  %v431_v7 = vld [vmem:[%s603_s1 + $0x20] sm:$0xff]   ;;  %402 = vmatprep.mubr.bf16.mxu1 %v436_v6  ;;  %v434_v10 = vld [vmem:[%s603_s1 + $0x38] sm:$0xff]  }
   0x6   :  { %27 = vst.msk [vmem:[#allocation2 + $0x50] sm:$0xff] %vm16_vm0, %v443_v1  ;;  %28 = vst.msk [vmem:[#allocation2 + $0x58] sm:$0xff] %vm16_vm0, %v443_v1  ;;  %v437_v11 = vld [vmem:[%s604_s0 + $0x8] sm:$0xff]   ;;  %v439_v13 = vld [vmem:[%s604_s0 + $0x10] sm:$0xff]  }
   0x7   :  { %29 = vst.msk [vmem:[#allocation2 + $0x60] sm:$0xff] %vm16_vm0, %v443_v1  ;;  %30 = vst.msk [vmem:[#allocation2 + $0x68] sm:$0xff] %vm16_vm0, %v443_v1  ;;  %381 = vmatpush3.bf16.msra.mxu0 %v428_v2  ;;  %419 = vmatpush3.bf16.msra.mxu1 %v428_v2  ;;  %v438_v12 = vld [vmem:[%s604_s0 + $0x28] sm:$0xff]   ;;  %v440_v14 = vld [vmem:[%s604_s0 + $0x30] sm:$0xff]  }
   0x8   :  { %31 = vst.msk [vmem:[#allocation2 + $0x70] sm:$0xff] %vm16_vm0, %v443_v1  ;;  %32 = vst.msk [vmem:[#allocation2 + $0x78] sm:$0xff] %vm16_vm0, %v443_v1  ;;  %382 = vmatprep.subr.bf16.mxu0 %v429_v3  ;;  %412 = vmatprep.subr.bf16.mxu1 %v429_v3  ;;  %v441_v15 = vld [vmem:[%s604_s0 + $0x18] sm:$0xff]   ;;  %v35_v17 = vld [vmem:[#allocation2 + $0x10] sm:$0xff] }
   0x9   :  { %v442_v16 = vld [vmem:[%s604_s0 + $0x38] sm:$0xff]   ;;  %v33_v19 = vld [vmem:[#allocation2] sm:$0xff]  ;;  %v34_v29 = vld [vmem:[#allocation2 + $0x8] sm:$0xff] }
   0xa   :  { %v36_v23 = vld [vmem:[#allocation2 + $0x18] sm:$0xff]  ;;  %v37_v43 = vld [vmem:[#allocation2 + $0x20] sm:$0xff]  ;;  %v38_v53 = vld [vmem:[#allocation2 + $0x28] sm:$0xff] }
   0xb   :  { %383 = vmatpush3.bf16.msra.mxu0 %v429_v3  ;;  %420 = vmatpush3.bf16.msra.mxu1 %v429_v3  ;;  %v39_v41 = vld [vmem:[#allocation2 + $0x30] sm:$0xff]  ;;  %v40_v47 = vld [vmem:[#allocation2 + $0x38] sm:$0xff] }
   0xc   :  { %384 = vmatprep.subr.bf16.mxu0 %v430_v4  ;;  %413 = vmatprep.subr.bf16.mxu1 %v430_v4  ;;  %v41_v20 = vld [vmem:[#allocation2 + $0x40] sm:$0xff]  ;;  %v42_v30 = vld [vmem:[#allocation2 + $0x48] sm:$0xff] }
   0xd   :  { %v43_v18 = vld [vmem:[#allocation2 + $0x50] sm:$0xff]  ;;  %v44_v24 = vld [vmem:[#allocation2 + $0x58] sm:$0xff] }
   0xe   :  { %v45_v44 = vld [vmem:[#allocation2 + $0x60] sm:$0xff]  ;;  %v46_v54 = vld [vmem:[#allocation2 + $0x68] sm:$0xff] }
   0xf   :  { %385 = vmatpush3.bf16.msra.mxu0 %v430_v4  ;;  %421 = vmatpush3.bf16.msra.mxu1 %v430_v4  ;;  %v47_v42 = vld [vmem:[#allocation2 + $0x70] sm:$0xff]  ;;  %v48_v48 = vld [vmem:[#allocation2 + $0x78] sm:$0xff] }
  0x10   :  { %386 = vmatprep.subr.bf16.mxu0 %v431_v7  ;;  %414 = vmatprep.subr.bf16.mxu1 %v431_v7 }
  0x13   :  { %387 = vmatpush3.bf16.msra.mxu0 %v431_v7  ;;  %422 = vmatpush3.bf16.msra.mxu1 %v431_v7 }
  0x14   :  { %388 = vmatprep.subr.bf16.mxu0 %v432_v8  ;;  %415 = vmatprep.subr.bf16.mxu1 %v432_v8 }
  0x17   :  { %389 = vmatpush3.bf16.msra.mxu0 %v432_v8  ;;  %423 = vmatpush3.bf16.msra.mxu1 %v432_v8 }
  0x18   :  { %390 = vmatprep.subr.bf16.mxu0 %v433_v9  ;;  %416 = vmatprep.subr.bf16.mxu1 %v433_v9 }
  0x1b   :  { %391 = vmatpush3.bf16.msra.mxu0 %v433_v9  ;;  %424 = vmatpush3.bf16.msra.mxu1 %v433_v9 }
  0x1c   :  { %392 = vmatprep.subr.bf16.mxu0 %v434_v10  ;;  %417 = vmatprep.subr.bf16.mxu1 %v434_v10 }
  0x1f   :  { %393 = vmatpush3.bf16.msra.mxu0 %v434_v10  ;;  %425 = vmatpush3.bf16.msra.mxu1 %v434_v10 }
  0x22   :  { %395 = vmatmul.mubr.bf16.vlgmr.msra.gmra.mrb[0].mxu0 %v437_v11  ;;  %403 = vmatmul.mubr.bf16.vlgmr.msra.gmra.mrb[0].mxu1 %v438_v12 }
  0x23   :  { %398 = vmatprep.mubr.bf16.mxu0 %v439_v13  ;;  %406 = vmatprep.mubr.bf16.mxu1 %v440_v14 }
  0x2a   :  { %399 = vmatmul.mubr.bf16.gmra.mrb[4].mxu0 %v441_v15  ;;  %407 = vmatmul.mubr.bf16.gmra.mrb[4].mxu1 %v442_v16 }
  0xf5   :  { %v396_v21 = vpop.f32.mrb[0].mxu0  ;;  %v404_v22 = vpop.f32.mrb[0].mxu1 }
  0xf6   :  { %v276_v25 = vadd.f32 %v396_v21, %v35_v17  ;;  %v284_v26 = vadd.f32 %v404_v22, %v43_v18  ;;  %v211_v27 = vpop.f32.mrb[1].mxu0  ;;  %v243_v28 = vpop.f32.mrb[1].mxu1 }
  0xf7   :  { %v274_v31 = vadd.f32 %v211_v27, %v33_v19  ;;  %v282_v32 = vadd.f32 %v243_v28, %v41_v20  ;;  %v397_v33 = vpop.f32.mrb[2].mxu0  ;;  %v405_v34 = vpop.f32.mrb[2].mxu1 }
  0xf8   :  { %293 = vst.msk [vmem:[#allocation2 + $0x10] sm:$0xff] %vm16_vm0, %v276_v25  ;;  %301 = vst.msk [vmem:[#allocation2 + $0x50] sm:$0xff] %vm16_vm0, %v284_v26  ;;  %v277_v35 = vadd.f32 %v397_v33, %v36_v23  ;;  %v285_v36 = vadd.f32 %v405_v34, %v44_v24  ;;  %v214_v37 = vpop.f32.mrb[3].mxu0  ;;  %v246_v38 = vpop.f32.mrb[3].mxu1 }
  0xf9   :  { %291 = vst.msk [vmem:[#allocation2] sm:$0xff] %vm16_vm0, %v274_v31  ;;  %299 = vst.msk [vmem:[#allocation2 + $0x40] sm:$0xff] %vm16_vm0, %v282_v32  ;;  %v275_v39 = vadd.f32 %v214_v37, %v34_v29  ;;  %v283_v40 = vadd.f32 %v246_v38, %v42_v30 }
  0xfa   :  { %294 = vst.msk [vmem:[#allocation2 + $0x18] sm:$0xff] %vm16_vm0, %v277_v35  ;;  %302 = vst.msk [vmem:[#allocation2 + $0x58] sm:$0xff] %vm16_vm0, %v285_v36 }
  0xfb   :  { %292 = vst.msk [vmem:[#allocation2 + $0x8] sm:$0xff] %vm16_vm0, %v275_v39  ;;  %300 = vst.msk [vmem:[#allocation2 + $0x48] sm:$0xff] %vm16_vm0, %v283_v40 }
  0xfd   :  { %v400_v45 = vpop.f32.mrb[4].mxu0  ;;  %v408_v46 = vpop.f32.mrb[4].mxu1 }
  0xfe   :  { %v280_v49 = vadd.f32 %v400_v45, %v39_v41  ;;  %v288_v50 = vadd.f32 %v408_v46, %v47_v42  ;;  %v227_v51 = vpop.f32.mrb[5].mxu0  ;;  %v259_v52 = vpop.f32.mrb[5].mxu1 }
  0xff   :  { %v312_v55 = vld [vmem:[#allocation2 + $0x10] sm:$0xff]  ;;  %v278_v57 = vadd.f32 %v227_v51, %v37_v43  ;;  %v286_v58 = vadd.f32 %v259_v52, %v45_v44  ;;  %v401_v59 = vpop.f32.mrb[6].mxu0  ;;  %v409_v60 = vpop.f32.mrb[6].mxu1 }
 0x100   :  { %v320_v56 = vld [vmem:[#allocation2 + $0x50] sm:$0xff]  ;;  %328 = vst.msk [vmem:[%s605_s2 + $0x10] sm:$0xff] %vm16_vm0, %v312_v55  ;;  %v310_v61 = vld [vmem:[#allocation2] sm:$0xff]  ;;  %297 = vst.msk [vmem:[#allocation2 + $0x30] sm:$0xff] %vm16_vm0, %v280_v49  ;;  %v281_v63 = vadd.f32 %v401_v59, %v40_v47  ;;  %v289_v0 = vadd.f32 %v409_v60, %v48_v48  ;;  %v230_v1 = vpop.f32.mrb[7].mxu0  ;;  %v262_v2 = vpop.f32.mrb[7].mxu1 }
 0x101   :  { %336 = vst.msk [vmem:[%s605_s2 + $0x50] sm:$0xff] %vm16_vm0, %v320_v56  ;;  %v318_v62 = vld [vmem:[#allocation2 + $0x40] sm:$0xff]  ;;  %305 = vst.msk [vmem:[#allocation2 + $0x70] sm:$0xff] %vm16_vm0, %v288_v50  ;;  %v313_v3 = vld [vmem:[#allocation2 + $0x18] sm:$0xff]  ;;  %v279_v5 = vadd.f32 %v230_v1, %v38_v53  ;;  %v287_v6 = vadd.f32 %v262_v2, %v46_v54 }
 0x102   :  { %326 = vst.msk [vmem:[%s605_s2] sm:$0xff] %vm16_vm0, %v310_v61  ;;  %334 = vst.msk [vmem:[%s605_s2 + $0x40] sm:$0xff] %vm16_vm0, %v318_v62  ;;  %v321_v4 = vld [vmem:[#allocation2 + $0x58] sm:$0xff]  ;;  %v311_v7 = vld [vmem:[#allocation2 + $0x8] sm:$0xff] }
 0x103   :  { %295 = vst.msk [vmem:[#allocation2 + $0x20] sm:$0xff] %vm16_vm0, %v278_v57  ;;  %303 = vst.msk [vmem:[#allocation2 + $0x60] sm:$0xff] %vm16_vm0, %v286_v58  ;;  %v319_v8 = vld [vmem:[#allocation2 + $0x48] sm:$0xff] }
 0x104   :  { %329 = vst.msk [vmem:[%s605_s2 + $0x18] sm:$0xff] %vm16_vm0, %v313_v3  ;;  %337 = vst.msk [vmem:[%s605_s2 + $0x58] sm:$0xff] %vm16_vm0, %v321_v4 }
 0x105   :  { %298 = vst.msk [vmem:[#allocation2 + $0x38] sm:$0xff] %vm16_vm0, %v281_v63  ;;  %306 = vst.msk [vmem:[#allocation2 + $0x78] sm:$0xff] %vm16_vm0, %v289_v0 }
 0x106   :  { %327 = vst.msk [vmem:[%s605_s2 + $0x8] sm:$0xff] %vm16_vm0, %v311_v7  ;;  %335 = vst.msk [vmem:[%s605_s2 + $0x48] sm:$0xff] %vm16_vm0, %v319_v8 }
 0x107   :  { %296 = vst.msk [vmem:[#allocation2 + $0x28] sm:$0xff] %vm16_vm0, %v279_v5  ;;  %304 = vst.msk [vmem:[#allocation2 + $0x68] sm:$0xff] %vm16_vm0, %v287_v6  ;;  %v316_v9 = vld [vmem:[#allocation2 + $0x30] sm:$0xff] }
 0x108   :  { %v324_v10 = vld [vmem:[#allocation2 + $0x70] sm:$0xff]  ;;  %332 = vst.msk [vmem:[%s605_s2 + $0x30] sm:$0xff] %vm16_vm0, %v316_v9 }
 0x109   :  { %340 = vst.msk [vmem:[%s605_s2 + $0x70] sm:$0xff] %vm16_vm0, %v324_v10 }
 0x10a   :  { %v314_v11 = vld [vmem:[#allocation2 + $0x20] sm:$0xff] }
 0x10b   :  { %v322_v12 = vld [vmem:[#allocation2 + $0x60] sm:$0xff]  ;;  %330 = vst.msk [vmem:[%s605_s2 + $0x20] sm:$0xff] %vm16_vm0, %v314_v11 }
 0x10c   :  { %338 = vst.msk [vmem:[%s605_s2 + $0x60] sm:$0xff] %vm16_vm0, %v322_v12  ;;  %v317_v13 = vld [vmem:[#allocation2 + $0x38] sm:$0xff] }
 0x10d   :  { %v325_v14 = vld [vmem:[#allocation2 + $0x78] sm:$0xff]  ;;  %333 = vst.msk [vmem:[%s605_s2 + $0x38] sm:$0xff] %vm16_vm0, %v317_v13 }
 0x10e   :  { %341 = vst.msk [vmem:[%s605_s2 + $0x78] sm:$0xff] %vm16_vm0, %v325_v14  ;;  %v315_v15 = vld [vmem:[#allocation2 + $0x28] sm:$0xff] }
 0x10f   :  { %v323_v16 = vld [vmem:[#allocation2 + $0x68] sm:$0xff]  ;;  %331 = vst.msk [vmem:[%s605_s2 + $0x28] sm:$0xff] %vm16_vm0, %v315_v15 }
 0x110   :  { %339 = vst.msk [vmem:[%s605_s2 + $0x68] sm:$0xff] %vm16_vm0, %v323_v16 }

</bundles_post_ra>
